<compile_context>
chip_gen: v5e
topology: v5e:2x2
jax: 0.10.0
libtpu: 0.0.40
codegen_flags: <defaults>
</compile_context>

<pallas_src>
import jax
import jax.numpy as jnp
from jax.experimental import pallas as pl
from jax.experimental.pallas import tpu as pltpu

EPS = 1e-5          # InstanceNorm2d default eps
NEG_SLOPE = 0.2     # LeakyReLU slope


def unet_down_kernel(p_ref, w_ref, o_ref, acc_ref):
    """One (batch, Cout-tile, K-tile) grid step.

    p_ref:   (1, tk, OHW)   bf16 im2col patches (K rows, spatial lanes)
    w_ref:   (tco, tk)      bf16 conv-weight tile
    o_ref:   (1, tco, OHW)  f32 output tile (NCHW-flattened), resident across k
    acc_ref: (tco, OHW)     f32 accumulator scratch
    """
    k = pl.program_id(2)

    @pl.when(k == 0)
    def _init():
        acc_ref[...] = jnp.zeros_like(acc_ref)

    # Conv as matmul on the MXU: (tco, tk) @ (tk, OHW), f32 accumulation.
    acc_ref[...] += jnp.dot(w_ref[...], p_ref[0],
                            preferred_element_type=jnp.float32)

    @pl.when(k == pl.num_programs(2) - 1)
    def _finalize():
        y = acc_ref[...]                                  # (tco, OHW) f32
        # InstanceNorm2d (no affine, biased variance) over spatial, per channel.
        mean = jnp.mean(y, axis=1, keepdims=True)
        d = y - mean                                      # reused for var + norm
        var = jnp.mean(d * d, axis=1, keepdims=True)
        yn = d * jax.lax.rsqrt(var + EPS)
        # LeakyReLU(0.2)
        o_ref[0] = jnp.where(yn >= 0, yn, NEG_SLOPE * yn).astype(o_ref.dtype)


def _im2col_kmajor(x, kh=4, kw=4, sh=2, sw=2, pad=1):
    """(B, Cin, H, W) -> (B, Cin*kh*kw, OH*OW), K-major (matches weight.reshape order)."""
    B, C, H, W = x.shape
    OH = (H + 2 * pad - kh) // sh + 1
    OW = (W + 2 * pad - kw) // sw + 1
    xp = jnp.pad(x, ((0, 0), (0, 0), (pad, pad), (pad, pad)))
    cols = []
    for i in range(kh):
        for j in range(kw):
            cols.append(xp[:, :, i:i + sh * OH:sh, j:j + sw * OW:sw])  # (B,C,OH,OW)
    cols = jnp.stack(cols, axis=2)                   # (B, C, kh*kw, OH, OW)
    # TODO(synk): fold patch extraction into the kernel (phase-split strided reads
    # of the padded input) to avoid materializing the 4x patch stream in HBM.
    return cols.reshape(B, C * kh * kw, OH * OW), OH, OW


def _pick_tile(dim, candidates):
    for t in candidates:
        if dim > t and dim % t == 0:
            return t
    return dim


def unet_down_1x2(x, weight, *, compute_dtype=jnp.bfloat16):
    """x: (B, Cin, H, W) float32 NCHW; weight: (Cout, Cin, 4, 4) OIHW (bias=False)."""
    B, Cin, H, W = x.shape
    Cout = weight.shape[0]
    K = Cin * 16

    patches, OH, OW = _im2col_kmajor(x)              # (B, K, OH*OW)
    OHW = OH * OW
    w2d = weight.reshape(Cout, K)                    # matches K-major patch order

    # bf16 operands for the dominant stream; accumulation stays f32 in-kernel.
    patches = patches.astype(compute_dtype)
    w2d = w2d.astype(compute_dtype)

    # Tile the reduction (K) and output-channel axes; keep OHW (the instance-norm
    # reduction axis) whole.  Tiles are 128/256/512 when they divide the dim,
    # otherwise the full (small) dim, so (sublane, lane) block rules are met.
    tk = _pick_tile(K, (512, 256, 128))
    tco = _pick_tile(Cout, (256, 128))
    nk = K // tk
    nco = Cout // tco

    out = pl.pallas_call(
        unet_down_kernel,
        out_shape=jax.ShapeDtypeStruct((B, Cout, OHW), jnp.float32),
        grid_spec=pltpu.PrefetchScalarGridSpec(
            num_scalar_prefetch=0,
            grid=(B, nco, nk),                       # reduction axis K innermost
            in_specs=[
                pl.BlockSpec((1, tk, OHW), lambda b, co, k: (b, k, 0)),
                pl.BlockSpec((tco, tk), lambda b, co, k: (co, k)),
            ],
            out_specs=pl.BlockSpec((1, tco, OHW), lambda b, co, k: (b, co, 0)),
            scratch_shapes=[pltpu.VMEM((tco, OHW), jnp.float32)],
        ),
        compiler_params=pltpu.CompilerParams(
            dimension_semantics=("parallel", "parallel", "arbitrary"),
            vmem_limit_bytes=48 * 1024 * 1024,
        ),
    )(patches, w2d)

    # (B, Cout, OH*OW) is already NCHW-flattened -> free reshape, no transpose.
    return out.reshape(B, Cout, OH, OW)


def _reference(x, weight):
    y = jax.lax.conv_general_dilated(
        x, weight, window_strides=(2, 2), padding=((1, 1), (1, 1)),
        dimension_numbers=("NCHW", "OIHW", "NCHW"))
    mean = y.mean(axis=(2, 3), keepdims=True)
    var = jnp.square(y - mean).mean(axis=(2, 3), keepdims=True)
    yn = (y - mean) * jax.lax.rsqrt(var + EPS)
    return jnp.where(yn >= 0, yn, NEG_SLOPE * yn)


if __name__ == "__main__":
    B, Cin, Cout, H, W = 2, 4, 8, 16, 16
    key = jax.random.PRNGKey(0)
    kx, kw = jax.random.split(key)
    x = jax.random.normal(kx, (B, Cin, H, W), dtype=jnp.float32)
    # deterministic synthetic conv weight (Cout, Cin, 4, 4), no bias (bias=False)
    weight = jax.random.normal(kw, (Cout, Cin, 4, 4), dtype=jnp.float32) * 0.1

    out = jax.block_until_ready(unet_down_1x2(x, weight))
    assert out.shape == (B, Cout, H // 2, W // 2), out.shape

    # Fair check: f32 reference on the same bf16-rounded operands (kernel uses
    # bf16 operands with f32 MXU accumulation).
    xq = x.astype(jnp.bfloat16).astype(jnp.float32)
    wq = weight.astype(jnp.bfloat16).astype(jnp.float32)
    ref_q = _reference(xq, wq)
    assert jnp.allclose(out, ref_q, atol=1e-2, rtol=1e-2), \
        float(jnp.abs(out - ref_q).max())

    # Sanity against the pure-f32 module semantics (bf16 operand noise only).
    ref = _reference(x, weight)
    assert jnp.allclose(out, ref, atol=5e-2, rtol=5e-2), \
        float(jnp.abs(out - ref).max())

    print("KERNEL_OK")
</pallas_src>

<mosaic_0001>
module attributes {stable_mosaic.version = 11 : i64} {
  func.func @unet_down_kernel(%arg0: i32, %arg1: i32, %arg2: i32, %arg3: memref<1x64x64xbf16, #tpu.memory_space<vmem>>, %arg4: memref<8x64xbf16, #tpu.memory_space<vmem>>, %arg5: memref<1x8x64xf32, #tpu.memory_space<vmem>>, %arg6: memref<8x64xf32, #tpu.memory_space<vmem>>) attributes {dimension_semantics = [#tpu.dimension_semantics<parallel>, #tpu.dimension_semantics<parallel>, #tpu.dimension_semantics<arbitrary>], iteration_bounds = array<i64: 2, 1, 1>, scalar_prefetch = 0 : i64, scratch_operands = 1 : i64, tpu.core_type = #tpu.core_type<tc>, window_params = [{transform_indices = @transform_0, window_bounds = array<i64: 1, 64, 64>}, {transform_indices = @transform_1, window_bounds = array<i64: 8, 64>}, {transform_indices = @transform_2, window_bounds = array<i64: 1, 8, 64>}]} {
    %c0_i32 = arith.constant 0 : i32
    %0 = arith.cmpi eq, %arg2, %c0_i32 : i32
    %1 = arith.extui %0 : i1 to i32
    %c0_i32_0 = arith.constant 0 : i32
    %2 = arith.cmpi ne, %1, %c0_i32_0 : i32
    scf.if %2 {
      %cst_11 = arith.constant 0.000000e+00 : f32
      %13 = vector.broadcast %cst_11 : f32 to vector<8x64xf32>
      %c0_12 = arith.constant 0 : index
      %c0_13 = arith.constant 0 : index
      %14 = vector.load %arg6[%c0_12, %c0_13] : memref<8x64xf32, #tpu.memory_space<vmem>>, vector<8x64xf32>
      tpu.vector_store %arg6[%c0_12, %c0_13], %13 {strides = array<i32>} : memref<8x64xf32, #tpu.memory_space<vmem>>, vector<8x64xf32>,
    } else {
    }
    %c0 = arith.constant 0 : index
    %c0_1 = arith.constant 0 : index
    %3 = vector.load %arg6[%c0, %c0_1] : memref<8x64xf32, #tpu.memory_space<vmem>>, vector<8x64xf32>
    %c0_2 = arith.constant 0 : index
    %c0_3 = arith.constant 0 : index
    %4 = vector.load %arg4[%c0_2, %c0_3] : memref<8x64xbf16, #tpu.memory_space<vmem>>, vector<8x64xbf16>
    %c0_4 = arith.constant 0 : index
    %c0_5 = arith.constant 0 : index
    %c0_6 = arith.constant 0 : index
    %5 = vector.load %arg3[%c0_4, %c0_5, %c0_6] : memref<1x64x64xbf16, #tpu.memory_space<vmem>>, vector<1x64x64xbf16>
    %6 = vector.shape_cast %5 : vector<1x64x64xbf16> to vector<64x64xbf16>
    %cst = arith.constant dense<0.000000e+00> : vector<8x64xf32>
    %7 = tpu.matmul %4, %6, %cst {dimension_numbers = #tpu.dot_dimension_numbers<[1], [0], [0], [1], [0, 0, 1, 1], [], []>} : vector<8x64xbf16>, vector<64x64xbf16>, vector<8x64xf32> -> vector<8x64xf32>
    %8 = arith.addf %3, %7 : vector<8x64xf32>
    %c0_7 = arith.constant 0 : index
    %c0_8 = arith.constant 0 : index
    %9 = vector.load %arg6[%c0_7, %c0_8] : memref<8x64xf32, #tpu.memory_space<vmem>>, vector<8x64xf32>
    tpu.vector_store %arg6[%c0_7, %c0_8], %8 {strides = array<i32>} : memref<8x64xf32, #tpu.memory_space<vmem>>, vector<8x64xf32>,
    %c0_i32_9 = arith.constant 0 : i32
    %10 = arith.cmpi eq, %arg2, %c0_i32_9 : i32
    %11 = arith.extui %10 : i1 to i32
    %c0_i32_10 = arith.constant 0 : i32
    %12 = arith.cmpi ne, %11, %c0_i32_10 : i32
    scf.if %12 {
      %c0_11 = arith.constant 0 : index
      %c0_12 = arith.constant 0 : index
      %13 = vector.load %arg6[%c0_11, %c0_12] : memref<8x64xf32, #tpu.memory_space<vmem>>, vector<8x64xf32>
      %cst_13 = arith.constant dense<0.000000e+00> : vector<8xf32>
      %14 = vector.multi_reduction <add>, %13, %cst_13 [1] : vector<8x64xf32> to vector<8xf32>
      %15 = vector.shape_cast %14 : vector<8xf32> to vector<8x1xf32>
      %cst_14 = arith.constant 6.400000e+01 : f32
      %16 = vector.broadcast %cst_14 : f32 to vector<8x1xf32>
      %17 = arith.divf %15, %16 : vector<8x1xf32>
      %18 = vector.broadcast %17 : vector<8x1xf32> to vector<8x64xf32>
      %19 = arith.subf %13, %18 : vector<8x64xf32>
      %20 = arith.mulf %19, %19 : vector<8x64xf32>
      %cst_15 = arith.constant dense<0.000000e+00> : vector<8xf32>
      %21 = vector.multi_reduction <add>, %20, %cst_15 [1] : vector<8x64xf32> to vector<8xf32>
      %22 = vector.shape_cast %21 : vector<8xf32> to vector<8x1xf32>
      %cst_16 = arith.constant 6.400000e+01 : f32
      %23 = vector.broadcast %cst_16 : f32 to vector<8x1xf32>
      %24 = arith.divf %22, %23 : vector<8x1xf32>
      %cst_17 = arith.constant 9.99999974E-6 : f32
      %25 = vector.broadcast %cst_17 : f32 to vector<8x1xf32>
      %26 = arith.addf %24, %25 : vector<8x1xf32>
      %27 = math.rsqrt %26 : vector<8x1xf32>
      %28 = vector.broadcast %27 : vector<8x1xf32> to vector<8x64xf32>
      %29 = arith.mulf %19, %28 : vector<8x64xf32>
      %cst_18 = arith.constant 0.000000e+00 : f32
      %30 = vector.broadcast %cst_18 : f32 to vector<8x64xf32>
      %31 = arith.cmpf oge, %29, %30 : vector<8x64xf32>
      %cst_19 = arith.constant 2.000000e-01 : f32
      %32 = vector.broadcast %cst_19 : f32 to vector<8x64xf32>
      %33 = arith.mulf %32, %29 : vector<8x64xf32>
      %34 = arith.select %31, %29, %33 : vector<8x64xi1>, vector<8x64xf32>
      %c0_20 = arith.constant 0 : index
      %c0_21 = arith.constant 0 : index
      %c0_22 = arith.constant 0 : index
      %35 = vector.load %arg5[%c0_20, %c0_21, %c0_22] : memref<1x8x64xf32, #tpu.memory_space<vmem>>, vector<1x8x64xf32>
      %36 = vector.shape_cast %35 : vector<1x8x64xf32> to vector<8x64xf32>
      %37 = vector.shape_cast %34 : vector<8x64xf32> to vector<1x8x64xf32>
      tpu.vector_store %arg5[%c0_20, %c0_21, %c0_22], %37 {strides = array<i32>} : memref<1x8x64xf32, #tpu.memory_space<vmem>>, vector<1x8x64xf32>,
    } else {
    }
    return
  }
  func.func @transform_0(%arg0: i32, %arg1: i32, %arg2: i32) -> (i32, i32, i32) {
    %c0_i32 = arith.constant 0 : i32
    %c0_i32_0 = arith.constant 0 : i32
    return %arg0, %arg2, %c0_i32 : i32, i32, i32
  }
  func.func @transform_1(%arg0: i32, %arg1: i32, %arg2: i32) -> (i32, i32) {
    %c0_i32 = arith.constant 0 : i32
    return %arg1, %arg2 : i32, i32
  }
  func.func @transform_2(%arg0: i32, %arg1: i32, %arg2: i32) -> (i32, i32, i32) {
    %c0_i32 = arith.constant 0 : i32
    %c0_i32_0 = arith.constant 0 : i32
    return %arg0, %arg1, %c0_i32 : i32, i32, i32
  }
}

</mosaic_0001>

<bundles_post_ra>
// kernel: tpu_custom_call.1
= control target key start
LH: loop header
LB: loop body
LE: loop exit
PB: predicated region body
PF: predicated region fallthrough
CT: control target
= control target key end

     0   :  { %7 = vsyncpa [#allocation4], 0  ;;  %s872_s0 = inlined_call_operand.hbm [shape: bf16[2,64,64], index: 0, kind: input, shape index: {}]   ;;  %s873_s1 = inlined_call_operand.hbm [shape: bf16[8,64], index: 1, kind: input, shape index: {}]   ;;  %s874_s2 = inlined_call_operand.hbm [shape: f32[2,8,64], index: 2, kind: output, shape index: {}]  }
   0x1   :  { %9 = vsyncpa [#allocation4 + $0x1], 0 }
   0x2   :  { %10 = vsyncpa [#allocation7], 0 }
   0x3   :  { %11 = vsyncpa [#allocation5], 0 }
   0x4   :  { %13 = vsyncpa [#allocation5 + $0x1], 0  ;;  %s714_s9 = smov 0   ;;  %s716_s10 = smov 0  }
   0x5   :  { %s718_s11 = smov 0   ;;  %s720_s12 = smov 0  }
   0x6   :  { %s722_s13 = smov 0   ;;  %s724_s14 = smov 0  }
   0x7 LB: > { %s427_s15 = sadd.s32 4294967295, %s692_s14   ;;  %s428_s16 = sadd.s32 4294967294, %s692_s14   ;;  %s692_s14 = sphi %s724_s14, %s19_s14   ;;  %s688_s13 = sphi %s722_s13, %s886_s13   ;;  %s684_s12 = sphi %s720_s12, %s885_s12   ;;  %s680_s11 = sphi %s718_s11, %s884_s11   ;;  %s676_s10 = sphi %s716_s10, %s883_s10   ;;  %s672_s9 = sphi %s714_s9, %s882_s9  }
   0x8   : > { %s47_s17 = sadd.s32 1, %s680_s11  ;;  %p54_p0 = scmp.ne.s32.totalorder %s680_s11, %s676_s10 }
   0x9   : > { %p55_p1 = scmp.eq.s32.totalorder %s692_s14, 0  ;;  %p60_p2 = scmp.ne.s32.totalorder %s676_s10, %s672_s9 }
   0xa   : > { %p752_p3 = scmp.eq.s32.totalorder %s427_s15, 0  ;;  %p114_p4 = scmp.eq.s32.totalorder %s427_s15, 1 }
   0xb   : > { %p756_p5 = por %p55_p1, %p54_p0  ;;  %p120_p6 = scmp.eq.s32.totalorder %s428_s16, 1 }
   0xc   : > { %p762_p7 = por %p752_p3, %p60_p2  ;;  %p766_p8 = por %p114_p4, %p54_p0 }
   0xd   : > { %p770_p9 = por %p120_p6, %p60_p2  ;;  %p429_p10 = scmp.ge.s32.totalorder %s692_s14, 1 }
   0xe   : > { %p127_p11 = scmp.lt.s32.totalorder %s692_s14, 3  ;;  %s142_s25 = sshll.u32 %s873_s1, 4  ;;  %s143_s25 = int_to_ptr.hbm [resolvable:$true] %s142_s25 }
   0xf   : > { %s694_s27 = smov [#allocation6]   ;;  %p431_p13 = scmp.ge.s32.totalorder %s692_s14, 2 }
  0x10   : > { %p779_p12 = pnand %p429_p10, %p127_p11  ;;  %s144_s28 = sshll.u32 %s694_s27, 4  ;;  %s145_s28 = int_to_ptr.vmem [resolvable:$true] %s144_s28 }
  0x11   : > { %p486_p1 = scmp.lt.s32.totalorder %s692_s14, 2  ;;  %s38_s30 = sadd.s32 1, %s688_s13 }
  0x12   : > { %p473_p0 = pneg %p779_p12  ;;  %p40_p6 = scmp.ge.s32.totalorder %s38_s30, 2 }
  0x13   : > { %p791_p4 = pnand %p486_p1, %p756_p5  ;;  %s155_s3 = sand.u32 1, %s680_s11  }
  0x14   : > { %p474_p2 = pnand %p473_p0, %p752_p3  ;;  %s888_s30 = smov (%p40_p6, %s38_s30), 0 }
  0x15   : > { %s432_s4 = sshll.u32 %s155_s3, 5  ;;  %s42_s5 = ssub.s32 %s688_s13, %s888_s30 }
  0x16   : > { %476 = dma.hbm_to_vmem [thread:$0]  (!%p474_p2), %s143_s25, 64, %s145_s28, [#allocation7]  }
  0x17   : > { %p45_p10 = scmp.eq.s32.totalorder %s42_s5, 0  ;;  %s460_s6 = sshll.u32 %s688_s13, 5 }
  0x18   : > { %s166_s15 = scalar_lea.hbm %s872_s0, %s460_s6  ;;  %s159_s16 = scalar_lea.vmem [#allocation3], %s432_s4 }
  0x19   : > { %s169_s19 = sshll.u32 %s159_s16, 4  ;;  %s167_s24 = sshll.u32 %s166_s15, 4  ;;  %s170_s19 = int_to_ptr.vmem [resolvable:$true] %s169_s19  ;;  %s168_s24 = int_to_ptr.hbm [resolvable:$true] %s167_s24 }
  0x1a   : > { %s808_s23 = scalar_select %p45_p10, %s680_s11, %s47_s17  }
  0x1b   : > { %s156_s25 = scalar_lea.sflag [#allocation4], %s155_s3  ;;  %s695_s27 = smov 64  }
  0x1c   : > { %s696_s28 = smov 4   ;;  %181 = sbr.rel (%p779_p12) target bundleno = 458 (0x1ca), region = 28 }
  0x1d   : > { %480 = dma.hbm_to_vmem [thread:$0]  (!%p791_p4), %s168_s24, 512, %s170_s19, %s156_s25, %s695_s27, %s695_s27, %s696_s28  }
  0x1e   : > { %s815_s5 = sand.u32 (!%p779_p12), 1, %s676_s10  }
  0x1f   : > { %s436_s4 = sshll.u32 (!%p779_p12), %s815_s5, 5  ;;  %s184_s17 = scalar_lea.sflag (!%p779_p12), [#allocation4], %s815_s5 }
  0x20   : > { %s187_s6 = scalar_lea.vmem (!%p779_p12), [#allocation3], %s436_s4 }
  0x21   : > { %659 = dma.done.wait (%p762_p7), %s184_s17, 512  }
  0x22   : > { %661 = vsyncadd (%p762_p7), %s184_s17, 4294966784 }
  0x23   : > { %663 = dma.done.wait (%p752_p3), [#allocation7], 64  }
  0x24   : > { %665 = vsyncadd (%p752_p3), [#allocation7], 4294967232  ;;  %vm220_vm0 = vcmask 523264   ;;  %v697_v0 = vmov 0.0   ;;  %v464_v1 = vld [vmem:[%s187_s6 + $0x18] sm:$0xff]  ;;  %v463_v2 = vld [vmem:[%s187_s6 + $0x10] sm:$0xff] }
  0x25   : > { %221 = vst.msk [vmem:[#allocation2] sm:$0xff] %vm220_vm0, %v697_v0  ;;  %264 = vmatpush.bf16.msra.mxu0 %v464_v1  ;;  %v462_v3 = vld [vmem:[%s187_s6 + $0x8] sm:$0xff]  ;;  %v461_v4 = vld [vmem:[%s187_s6] sm:$0xff]  ;;  %v698_v12 = vmov 64.0   ;;  %s438_s18 = sshll.u32 %s815_s5, 3  ;;  %s457_s20 = sshll.u32 %s684_s12, 3 }
  0x26   : > { %v223_v5 = vld [vmem:[#allocation6] sm:$0xf]  ;;  %542 = vrcp.f32 %v698_v12  ;;  %s324_s3 = scalar_lea.hbm %s874_s2, %s457_s20  ;;  %s213_s7 = scalar_lea.vmem [#allocation8], %s438_s18 }
  0x27   : > { %s326_s8 = sshll.u32 %s213_s7, 4  ;;  %s328_s15 = sshll.u32 %s324_s3, 4  ;;  %s327_s8 = int_to_ptr.vmem [resolvable:$true] %s326_s8  ;;  %s329_s15 = int_to_ptr.hbm [resolvable:$true] %s328_s15 }
  0x28   : > { %s313_s12 = scalar_lea.sflag [#allocation5], %s815_s5  ;;  %s620_s16 = sshra.s32 %s329_s15, 4  ;;  %s621_s16 = int_to_ptr.hbm [resolvable:$true] %s620_s16 }
  0x29   : > { %265 = vmatpush.bf16.msra.mxu0 %v463_v2  ;;  %s622_s19 = scalar_lea.hbm %s621_s16, 8  ;;  %s626_s27 = scalar_lea.hbm %s874_s2, 16 }
  0x2a   : > { %p623_p3 = scmp.ne.s32.totalorder %s621_s16, %s622_s19  ;;  %p627_p11 = scmp.lt.s32.totalorder %s621_s16, %s874_s2 }
  0x2b   : > { %p628_p12 = scmp.lt.s32.totalorder %s626_s27, %s622_s19 }
  0x2c   : > { %v222_v6 = vld [vmem:[#allocation2] sm:$0xff]  ;;  %v543_v13 = vpop.eup %542  ;;  %p624_p5 = pnand %p623_p3, %p766_p8 }
  0x2d   : > { %266 = vmatpush.bf16.msra.mxu0 %v462_v3  ;;  %v283_v14 = vmul.f32 64.0, %v543_v13  ;;  %vm287_vm1 = vweird.f32 %v543_v13  ;;  %p629_p0 = por %p628_p12, %p627_p11 }
  0x2e   : > { %p625_p7 = pneg %p624_p5 }
  0x2f   : > { %v284_v15 = vsub.f32 1.0, %v283_v14 }
  0x30   : > { %p630_p1 = pnand %p629_p0, %p625_p7 }
  0x31   : > { %267 = vmatpush.bf16.msra.mxu0 %v461_v4  ;;  %v285_v16 = vmul.f32 %v543_v13, %v284_v15 }
  0x33   : > { %v286_v17 = vadd.f32 %v543_v13, %v285_v16 }
  0x34   : > { %455 = vmatmul.msk.bf16.vlgmr.msra.gmra.mxu0 %vm220_vm0, %v223_v5 }
  0x35   : > { %v288_v18 = vsel %vm287_vm1, %v543_v13, %v286_v17 }
  0xb1   : > { %v269_v7 = vpop.f32.mrf.mxu0 }
  0xb2   : > { %v273_v8 = vadd.f32 %v269_v7, %v222_v6 }
  0xb4   : > { %274 = vst.msk [vmem:[#allocation2] sm:$0xff] %vm220_vm0, %v273_v8 }
  0xb9   : > { %v271_v9 = vpop.f32.mrf.mxu0 }
  0xbb   : > { %v278_v10 = vld [vmem:[#allocation2] sm:$0xff] }
  0xbc   : > { %v279_v11 = vsel %vm220_vm0, %v278_v10, 0.0 }
  0xbd   : > { %280 = vadd.xlane.f32.xlu0 %v279_v11 }
 0x130   : > { %v281_v19 = vpop.xlane.xlu0 %280 }
 0x131   : > { %v289_v20 = vmul.f32 %v288_v18, %v281_v19 }
 0x133   : > { %v290_v21 = vsub.f32 %v278_v10, %v289_v20 }
 0x135   : > { %v291_v22 = vmul.f32 %v290_v21, %v290_v21 }
 0x137   : > { %v292_v23 = vsel %vm220_vm0, %v291_v22, 0.0 }
 0x138   : > { %293 = vadd.xlane.f32.xlu0 %v292_v23 }
 0x1ab   : > { %v294_v24 = vpop.xlane.xlu0 %293 }
 0x1ac   : > { %v295_v25 = vmul.f32 %v294_v24, %v288_v18 }
 0x1ae   : > { %v296_v26 = vadd.f32 1e-05, %v295_v25 }
 0x1b0   : > { %544 = vrsqrt.f32 %v296_v26  ;;  %vm303_vm3 = vweird.f32 %v296_v26 }
 0x1b6   : > { %v545_v27 = vpop.eup %544 }
 0x1b7   : > { %v298_v28 = vmul.f32 %v545_v27, %v296_v26  ;;  %vm304_vm2 = vweird.f32 %v545_v27 }
 0x1b8   : > { %vm305_vm4 = vmor %vm303_vm3, %vm304_vm2 }
 0x1b9   : > { %v299_v29 = vmul.f32 %v545_v27, %v298_v28 }
 0x1bb   : > { %v300_v30 = vmul.f32 0.5, %v299_v29 }
 0x1bd   : > { %v301_v31 = vsub.f32 1.5, %v300_v30 }
 0x1bf   : > { %v302_v32 = vmul.f32 %v545_v27, %v301_v31 }
 0x1c1   : > { %v306_v33 = vsel %vm305_vm4, %v545_v27, %v302_v32 }
 0x1c2   : > { %v307_v34 = vmul.f32 %v306_v33, %v290_v21 }
 0x1c4   : > { %vm308_vm5 = vcmp.ge.f32.partialorder %v307_v34, 0.0  ;;  %v309_v35 = vmul.f32 0.2, %v307_v34 }
 0x1c6   : > { %v310_v36 = vsel %vm308_vm5, %v307_v34, %v309_v35 }
 0x1c7   : > { %311 = vst.msk [vmem:[%s213_s7] sm:$0xff] %vm220_vm0, %v310_v36 }
 0x1c8   : > { %633 = shalt.err (!%p630_p1)
}
 0x1c9   : > { %471 = dma.vmem_to_hbm [thread:$0]  (%p766_p8), %s327_s8, 128, %s329_s15, %s313_s12  }
 0x1ca PF: > { %s340_s5 = sand.u32 1, %s672_s9   ;;  %p482_p2 = pnand %p431_p13, %p770_p9 }
 0x1cb   : > { %s341_s17 = scalar_lea.sflag [#allocation5], %s340_s5 }
 0x1cc   : > { %p483_p4 = pneg %p482_p2 }
 0x1ce   : > { %667 = dma.done.wait (%p483_p4), %s341_s17, 128  }
 0x1cf   : > { %669 = vsyncadd (%p483_p4), %s341_s17, 4294967168  ;;  %s19_s14 = sadd.s32 1, %s692_s14   ;;  %s882_s9 = smov %s676_s10 }
 0x1d0   : > { %p16_p6 = scmp.ge.s32.totalorder %s19_s14, 4   ;;  %s883_s10 = smov %s680_s11 }
 0x1d1   : > { %s884_s11 = smov %s808_s23  ;;  %s885_s12 = smov %s688_s13 }
 0x1d2   : > { %s886_s13 = smov %s888_s30  ;;  %18 = sbr.rel (!%p16_p6) target bundleno = 7 (0x7), region = 86 }
 0x1d7   :  { %347 = vsyncpa [#allocation4], 1 }
 0x1d8   :  { %349 = vsyncpa [#allocation4 + $0x1], 1 }
 0x1d9   :  { %350 = vsyncpa [#allocation7], 1 }
 0x1da   :  { %351 = vsyncpa [#allocation5], 1 }
 0x1db   :  { %353 = vsyncpa [#allocation5 + $0x1], 1 }

</bundles_post_ra>
